<compile_context>
chip_gen: v6e
topology: v6e:2x2x1
jax: 0.10.0
libtpu: 0.0.40
codegen_flags: <defaults>
</compile_context>

<pallas_src>
from functools import partial

import jax
import jax.numpy as jnp
from jax.experimental import pallas as pl
from jax.experimental.pallas import tpu as pltpu


def _round_up(x, m):
    return (x + m - 1) // m * m


def _patch_embed_kernel(p_ref, w_ref, b_ref, o_ref):
    # p_ref: (tm, Kp) bf16 im2col rows for this tile.
    # w_ref: (Kp, hidden) bf16 projection weight (VMEM-resident across grid).
    # b_ref: (1, hidden)  f32 bias (VMEM-resident).
    # One MXU push per tile with f32 accumulation; bias broadcast over
    # sublanes; lane-dense store (hidden is a multiple of 128).
    acc = jnp.dot(p_ref[...], w_ref[...], preferred_element_type=jnp.float32)
    o_ref[...] = (acc + b_ref[...]).astype(o_ref.dtype)


@partial(jax.jit, static_argnums=(3,))
def patch_embed_forward(x, conv_w, conv_b, patch):
    """PatchEmbed forward.

    x:      (B, Cin, H, W)       NCHW, like the PyTorch module.
    conv_w: (hidden, Cin, p, p)  PyTorch Conv2d weight layout (OIHW).
    conv_b: (hidden,)            Conv2d bias.
    Returns (B, (H/p)*(W/p), hidden).
    """
    B, Cin, H, W = x.shape
    hidden = conv_w.shape[0]
    Hp, Wp = H // patch, W // patch
    N = Hp * Wp
    M = B * N
    K = Cin * patch * patch

    compute_dtype = jnp.bfloat16

    # im2col: (B,Cin,Hp,p,Wp,p) -> (B,Hp,Wp,Cin,p,p) -> (M,K).  Flatten order
    # (c, kh, kw) matches the OIHW weight reshape below.  Layout plumbing only
    # (all FLOPs are in the matmul); cast to bf16 first so the materialized
    # patches array costs half the HBM bytes.
    patches = x.astype(compute_dtype).reshape(B, Cin, Hp, patch, Wp, patch)
    patches = patches.transpose(0, 2, 4, 1, 3, 5).reshape(M, K)

    w2d = conv_w.reshape(hidden, K).T.astype(compute_dtype)   # (K, hidden)
    b2d = conv_b.reshape(1, hidden).astype(jnp.float32)       # (1, hidden)

    # Pad K to a lane multiple (unmasked vld, clean (16,128) bf16 tiles) and
    # pad/tile the row axis.  tm: as large as reasonable, multiple of 16.
    Kp = _round_up(K, 128)
    tm = min(512, _round_up(M, 16))
    Mp = _round_up(M, tm)
    if Kp != K:
        patches = jnp.pad(patches, ((0, 0), (0, Kp - K)))
        w2d = jnp.pad(w2d, ((0, Kp - K), (0, 0)))
    if Mp != M:
        patches = jnp.pad(patches, ((0, Mp - M), (0, 0)))

    grid = (Mp // tm,)

    # Per-tile VMEM footprint: double-buffered patches + output tiles, plus the
    # resident weight/bias.  2x headroom, floor 16 MiB, cap 48 MiB (fits v7x's
    # 64 MiB physical VMEM with room to spare).
    vmem_bytes = (2 * tm * Kp * patches.dtype.itemsize
                  + 2 * tm * hidden * x.dtype.itemsize
                  + Kp * hidden * w2d.dtype.itemsize
                  + hidden * 4)
    vmem_limit = int(min(max(2 * vmem_bytes, 16 * 2**20), 48 * 2**20))

    out = pl.pallas_call(
        _patch_embed_kernel,
        out_shape=jax.ShapeDtypeStruct((Mp, hidden), x.dtype),
        grid=grid,
        in_specs=[
            pl.BlockSpec((tm, Kp), lambda i: (i, 0)),        # row tiles, pipelined
            pl.BlockSpec((Kp, hidden), lambda i: (0, 0)),    # weight stays resident
            pl.BlockSpec((1, hidden), lambda i: (0, 0)),     # bias stays resident
        ],
        out_specs=pl.BlockSpec((tm, hidden), lambda i: (i, 0)),
        compiler_params=pltpu.CompilerParams(
            dimension_semantics=("parallel",),   # megacore sharding on v7x
            vmem_limit_bytes=vmem_limit,
        ),
    )(patches, w2d, b2d)

    return out[:M].reshape(B, N, hidden)


def patch_embed_ref(x, conv_w, conv_b, patch):
    """Pure-JAX reference mirroring the PyTorch forward exactly."""
    y = jax.lax.conv_general_dilated(
        x, conv_w,
        window_strides=(patch, patch),
        padding="VALID",
        dimension_numbers=("NCHW", "OIHW", "NCHW"),
    )
    y = y + conv_b.reshape(1, -1, 1, 1)
    B, C, Hp, Wp = y.shape
    return y.transpose(0, 2, 3, 1).reshape(B, Hp * Wp, C)   # b c h w -> b (h w) c


if __name__ == "__main__":
    B, Cin, H, W = 2, 3, 16, 16      # module hard-codes in_channels=3
    patch = 4
    hidden = 128                      # lane-dense output width (multiple of 128)

    k1, k2, k3 = jax.random.split(jax.random.PRNGKey(0), 3)
    x = jax.random.normal(k1, (B, Cin, H, W), jnp.float32)
    conv_w = (0.02 * jax.random.normal(k2, (hidden, Cin, patch, patch))).astype(jnp.float32)
    conv_b = (0.01 * jax.random.normal(k3, (hidden,))).astype(jnp.float32)

    out = jax.block_until_ready(patch_embed_forward(x, conv_w, conv_b, patch))
    ref = patch_embed_ref(x, conv_w, conv_b, patch)

    assert out.shape == (B, (H // patch) * (W // patch), hidden), out.shape
    assert bool(jnp.allclose(out, ref, atol=2e-2, rtol=2e-2)), "mismatch vs conv reference"
    print("KERNEL_OK")
</pallas_src>

<mosaic_0001>
module attributes {stable_mosaic.version = 11 : i64} {
  func.func @_patch_embed_kernel(%arg0: i32, %arg1: memref<32x128xbf16, #tpu.memory_space<vmem>>, %arg2: memref<128x128xbf16, #tpu.memory_space<vmem>>, %arg3: memref<1x128xf32, #tpu.memory_space<vmem>>, %arg4: memref<32x128xf32, #tpu.memory_space<vmem>>) attributes {dimension_semantics = [#tpu.dimension_semantics<parallel>], iteration_bounds = array<i64: 1>, scalar_prefetch = 0 : i64, scratch_operands = 0 : i64, tpu.core_type = #tpu.core_type<tc>, window_params = [{transform_indices = @transform_0, window_bounds = array<i64: 32, 128>}, {pipeline_mode = #tpu.pipeline_mode<synchronous>, transform_indices = @transform_1, window_bounds = array<i64: 128, 128>}, {pipeline_mode = #tpu.pipeline_mode<synchronous>, transform_indices = @transform_2, window_bounds = array<i64: 1, 128>}, {transform_indices = @transform_3, window_bounds = array<i64: 32, 128>}]} {
    %c0 = arith.constant 0 : index
    %c0_0 = arith.constant 0 : index
    %0 = vector.load %arg1[%c0, %c0_0] : memref<32x128xbf16, #tpu.memory_space<vmem>>, vector<32x128xbf16>
    %c0_1 = arith.constant 0 : index
    %c0_2 = arith.constant 0 : index
    %1 = vector.load %arg2[%c0_1, %c0_2] : memref<128x128xbf16, #tpu.memory_space<vmem>>, vector<128x128xbf16>
    %cst = arith.constant dense<0.000000e+00> : vector<32x128xf32>
    %2 = tpu.matmul %0, %1, %cst {dimension_numbers = #tpu.dot_dimension_numbers<[1], [0], [0], [1], [0, 0, 1, 1], [], []>} : vector<32x128xbf16>, vector<128x128xbf16>, vector<32x128xf32> -> vector<32x128xf32>
    %c0_3 = arith.constant 0 : index
    %c0_4 = arith.constant 0 : index
    %3 = vector.load %arg3[%c0_3, %c0_4] : memref<1x128xf32, #tpu.memory_space<vmem>>, vector<1x128xf32>
    %4 = vector.broadcast %3 : vector<1x128xf32> to vector<32x128xf32>
    %5 = arith.addf %2, %4 : vector<32x128xf32>
    %c0_5 = arith.constant 0 : index
    %c0_6 = arith.constant 0 : index
    %6 = vector.load %arg4[%c0_5, %c0_6] : memref<32x128xf32, #tpu.memory_space<vmem>>, vector<32x128xf32>
    tpu.vector_store %arg4[%c0_5, %c0_6], %5 {strides = array<i32>} : memref<32x128xf32, #tpu.memory_space<vmem>>, vector<32x128xf32>,
    return
  }
  func.func @transform_0(%arg0: i32) -> (i32, i32) {
    %c0_i32 = arith.constant 0 : i32
    %c0_i32_0 = arith.constant 0 : i32
    return %arg0, %c0_i32 : i32, i32
  }
  func.func @transform_1(%arg0: i32) -> (i32, i32) {
    %c0_i32 = arith.constant 0 : i32
    %c0_i32_0 = arith.constant 0 : i32
    %c0_i32_1 = arith.constant 0 : i32
    return %c0_i32, %c0_i32_0 : i32, i32
  }
  func.func @transform_2(%arg0: i32) -> (i32, i32) {
    %c0_i32 = arith.constant 0 : i32
    %c0_i32_0 = arith.constant 0 : i32
    %c0_i32_1 = arith.constant 0 : i32
    return %c0_i32, %c0_i32_0 : i32, i32
  }
  func.func @transform_3(%arg0: i32) -> (i32, i32) {
    %c0_i32 = arith.constant 0 : i32
    %c0_i32_0 = arith.constant 0 : i32
    return %arg0, %c0_i32 : i32, i32
  }
}

</mosaic_0001>

<bundles_post_ra>
// kernel: patch_embed_forward.1
= control target key start
LH: loop header
LB: loop body
LE: loop exit
PB: predicated region body
PF: predicated region fallthrough
CT: control target
= control target key end

     0   :  { %s307_s0 = inlined_call_operand.vmem [shape: bf16[32,128], index: 0, kind: input, shape index: {}]   ;;  %s308_s1 = inlined_call_operand.vmem [shape: bf16[128,128], index: 1, kind: input, shape index: {}]   ;;  %s309_s2 = inlined_call_operand.vmem [shape: f32[1,128], index: 2, kind: input, shape index: {}]   ;;  %s310_s3 = inlined_call_operand.hbm [shape: f32[32,128], index: 3, kind: output, shape index: {}]  }
   0x1   :  { %v216_v0 = vld [vmem:[%s308_s1 + $0x38] sm:$0xff]   ;;  %v217_v1 = vld [vmem:[%s308_s1 + $0x30] sm:$0xff]   ;;  %v218_v2 = vld [vmem:[%s308_s1 + $0x28] sm:$0xff]  }
   0x2   :  { %193 = vmatprep.subr.bf16.mxu0 %v216_v0  ;;  %v219_v3 = vld [vmem:[%s308_s1 + $0x20] sm:$0xff]  }
   0x3   :  { %194 = vmatpush3.bf16.msra.mxu0 %v216_v0  ;;  %v224_v4 = vld [vmem:[%s307_s0] sm:$0xff]  }
   0x4   :  { %195 = vmatprep.subr.bf16.mxu0 %v217_v1  ;;  %209 = vmatprep.mubr.bf16.mxu0 %v224_v4 }
   0x7   :  { %196 = vmatpush3.bf16.msra.mxu0 %v217_v1 }
   0x8   :  { %197 = vmatprep.subr.bf16.mxu0 %v218_v2 }
   0x9   :  { %8 = vsyncpa [#allocation3], 0  ;;  %v220_v5 = vld [vmem:[%s308_s1 + $0x18] sm:$0xff]   ;;  %v221_v6 = vld [vmem:[%s308_s1 + $0x10] sm:$0xff]   ;;  %s248_s7 = smov [#allocation2]  }
   0xa   :  { %v222_v7 = vld [vmem:[%s308_s1 + $0x8] sm:$0xff]   ;;  %v223_v8 = vld [vmem:[%s308_s1] sm:$0xff]   ;;  %s161_s8 = sshll.u32 %s248_s7, 4  ;;  %s162_s8 = int_to_ptr.vmem [resolvable:$true] %s161_s8 }
   0xb   :  { %198 = vmatpush3.bf16.msra.mxu0 %v218_v2  ;;  %v225_v9 = vld [vmem:[%s307_s0 + $0x8] sm:$0xff]   ;;  %v172_v10 = vld [vmem:[%s309_s2] ss:$0 sm:$0xff]  ;;  %s226_s0 = scalar_lea.vmem %s162_s8, 512  ;;  %p231_p1 = scmp.lt.s32.totalorder %s162_s8, %s162_s8 }
   0xc   :  { %199 = vmatprep.subr.bf16.mxu0 %v219_v3  ;;  %p227_p0 = scmp.ne.s32.totalorder %s162_s8, %s226_s0  ;;  %p232_p2 = scmp.lt.s32.totalorder %s226_s0, %s226_s0 }
   0xe   :  { %p233_p3 = por %p232_p2, %p231_p1 }
   0xf   :  { %200 = vmatpush3.bf16.msra.mxu0 %v219_v3 }
  0x10   :  { %201 = vmatprep.subr.bf16.mxu0 %v220_v5  ;;  %p234_p4 = pnand %p233_p3, %p227_p0 }
  0x13   :  { %202 = vmatpush3.bf16.msra.mxu0 %v220_v5 }
  0x14   :  { %203 = vmatprep.subr.bf16.mxu0 %v221_v6 }
  0x17   :  { %204 = vmatpush3.bf16.msra.mxu0 %v221_v6 }
  0x18   :  { %205 = vmatprep.subr.bf16.mxu0 %v222_v7 }
  0x1b   :  { %206 = vmatpush3.bf16.msra.mxu0 %v222_v7 }
  0x1c   :  { %207 = vmatprep.subr.bf16.mxu0 %v223_v8 }
  0x1f   :  { %208 = vmatpush3.bf16.msra.mxu0 %v223_v8 }
  0x22   :  { %210 = vmatmul.mubr.bf16.vlgmr.msra.gmra.mxu0 %v225_v9 }
  0xe2   :  { %v211_v11 = vpop.f32.mrf.mxu0 }
  0xe3   :  { %v146_v12 = vadd.f32 %v211_v11, %v172_v10 }
  0xe4   :  { %v137_v13 = vpop.f32.mrf.mxu0 }
  0xe5   :  { %154 = vst [vmem:[#allocation2 + $0x10] sm:$0xff] %v146_v12  ;;  %v138_v14 = vadd.f32 %v172_v10, %v137_v13 }
  0xe6   :  { %v212_v15 = vpop.f32.mrf.mxu0 }
  0xe7   :  { %152 = vst [vmem:[#allocation2] sm:$0xff] %v138_v14  ;;  %v149_v16 = vadd.f32 %v212_v15, %v172_v10 }
  0xe8   :  { %v140_v17 = vpop.f32.mrf.mxu0 }
  0xe9   :  { %155 = vst [vmem:[#allocation2 + $0x18] sm:$0xff] %v149_v16  ;;  %v141_v18 = vadd.f32 %v172_v10, %v140_v17 }
  0xeb   :  { %153 = vst [vmem:[#allocation2 + $0x8] sm:$0xff] %v141_v18 }
  0xec   :  { %237 = shalt.err (!%p234_p4)
}
  0xed   :  { %s249_s1 = smov 128   ;;  %s250_s2 = smov 8  }
  0xee   :  { %167 = dma.vmem_to_hbm [thread:$0]  %s162_s8, 512, %s310_s3, [#allocation3], %s249_s1, %s249_s1, %s250_s2  }
  0xef   :  { %246 = dma.done.wait [#allocation3], 512  }
  0xf0   :  { %247 = vsyncadd [#allocation3], 4294966784 }
  0xf1   :  { %171 = vsyncpa [#allocation3], 1 }

</bundles_post_ra>
